<compile_context>
chip_gen: v7x
topology: tpu7x:2x2x1
jax: 0.10.0
libtpu: 0.0.40
codegen_flags: <defaults>
</compile_context>

<pallas_src>
import jax
import jax.numpy as jnp
from jax.experimental import pallas as pl
from jax.experimental.pallas import tpu as pltpu

EPS = 1e-6  # nn.PairwiseDistance default eps (added to the difference, as in PyTorch)


def _euclidean_loss2_kernel(pred_ref, target_ref, mask_ref, loss_ref, msum_ref):
    # pred_ref/target_ref: (C, tn)   mask_ref: (1, tn)
    # loss_ref/msum_ref:   (1, tn)   lane-wise partial sums, resident across the inner axis
    @pl.when(pl.program_id(1) == 0)
    def _():
        loss_ref[...] = jnp.zeros_like(loss_ref)
        msum_ref[...] = jnp.zeros_like(msum_ref)

    d = pred_ref[...] - target_ref[...] + EPS                        # (C, tn)
    dist = jnp.sqrt(jnp.sum(d * d, axis=0, keepdims=True))           # (1, tn)

    m = mask_ref[...]                                                # (1, tn)
    sel = (m == 1.0).astype(jnp.float32)                             # boolean row-selection

    loss_ref[...] += dist * sel
    msum_ref[...] += m


def euclidean_loss2(pred, target, mask, *, tn=None):
    """pred/target: (B, C, H, W); mask: (B, H, W) (or (B,1,H,W)). Returns scalar loss."""
    B, C, H, W = pred.shape
    HW = H * W

    pred2 = pred.reshape(B, C, HW).astype(jnp.float32)      # contiguous reshape, no transpose
    targ2 = target.reshape(B, C, HW).astype(jnp.float32)
    mask2 = mask.reshape(B, 1, HW).astype(jnp.float32)

    # Pad the pixel axis only if it is not already lane-aligned. Padded lanes have
    # mask = 0 -> selector 0 -> contribute 0 to both sums.
    if HW % 128 != 0:
        pad = (-HW) % 128
        pred2 = jnp.pad(pred2, ((0, 0), (0, 0), (0, pad)))
        targ2 = jnp.pad(targ2, ((0, 0), (0, 0), (0, pad)))
        mask2 = jnp.pad(mask2, ((0, 0), (0, 0), (0, pad)))
        HW += pad

    if tn is None:
        for cand in (16384, 8192, 4096, 2048, 1024, 512, 256, 128):
            if HW % cand == 0:
                tn = cand
                break
    assert tn is not None and HW % tn == 0 and tn % 128 == 0
    steps = HW // tn

    row_spec = pl.BlockSpec((None, 1, tn), lambda b, i: (b, 0, 0))   # resident per-batch acc
    loss_part, msum_part = pl.pallas_call(
        _euclidean_loss2_kernel,
        out_shape=(
            jax.ShapeDtypeStruct((B, 1, tn), jnp.float32),
            jax.ShapeDtypeStruct((B, 1, tn), jnp.float32),
        ),
        grid_spec=pltpu.PrefetchScalarGridSpec(
            num_scalar_prefetch=0,
            grid=(B, steps),
            in_specs=[
                pl.BlockSpec((None, C, tn), lambda b, i: (b, 0, i)),
                pl.BlockSpec((None, C, tn), lambda b, i: (b, 0, i)),
                pl.BlockSpec((None, 1, tn), lambda b, i: (b, 0, i)),
            ],
            out_specs=(row_spec, row_spec),
        ),
        compiler_params=pltpu.CompilerParams(
            dimension_semantics=("parallel", "arbitrary")),
    )(pred2, targ2, mask2)

    # Single cross-lane reduction, done once in glue (not per grid step).
    return jnp.sum(loss_part) / jnp.sum(msum_part)


def _reference(pred, target, mask):
    """Pure-JAX transcription of the PyTorch forward (for verification)."""
    B, C, H, W = pred.shape
    p = jnp.transpose(pred, (0, 2, 3, 1)).reshape(-1, C)
    t = jnp.transpose(target, (0, 2, 3, 1)).reshape(-1, C)
    m = mask.reshape(-1)
    dist = jnp.sqrt(jnp.sum((p - t + EPS) ** 2, axis=-1))
    sel = (m == 1.0).astype(jnp.float32)
    return jnp.sum(dist * sel) / jnp.sum(mask)


if __name__ == "__main__":
    key = jax.random.PRNGKey(0)
    k1, k2, k3 = jax.random.split(key, 3)

    B, C, H, W = 2, 3, 16, 16  # scene-coordinate regression: 3 coordinate channels
    pred = jax.random.normal(k1, (B, C, H, W), dtype=jnp.float32)
    target = jax.random.normal(k2, (B, C, H, W), dtype=jnp.float32)
    mask = (jax.random.uniform(k3, (B, H, W)) > 0.3).astype(jnp.float32)

    loss = euclidean_loss2(pred, target, mask)
    jax.block_until_ready(loss)

    ref = _reference(pred, target, mask)
    assert jnp.allclose(loss, ref, rtol=1e-5, atol=1e-5), (loss, ref)

    print("KERNEL_OK")
</pallas_src>

<mosaic_0001>
module attributes {stable_mosaic.version = 11 : i64} {
  func.func @_euclidean_loss2_kernel(%arg0: i32, %arg1: i32, %arg2: memref<1x3x256xf32, #tpu.memory_space<vmem>>, %arg3: memref<1x3x256xf32, #tpu.memory_space<vmem>>, %arg4: memref<1x1x256xf32, #tpu.memory_space<vmem>>, %arg5: memref<1x1x256xf32, #tpu.memory_space<vmem>>, %arg6: memref<1x1x256xf32, #tpu.memory_space<vmem>>) attributes {dimension_semantics = [#tpu.dimension_semantics<parallel>, #tpu.dimension_semantics<arbitrary>], iteration_bounds = array<i64: 2, 1>, scalar_prefetch = 0 : i64, scratch_operands = 0 : i64, tpu.core_type = #tpu.core_type<tc>, window_params = [{transform_indices = @transform_0, window_bounds = array<i64: 1, 3, 256>}, {transform_indices = @transform_1, window_bounds = array<i64: 1, 3, 256>}, {transform_indices = @transform_2, window_bounds = array<i64: 1, 1, 256>}, {transform_indices = @transform_3, window_bounds = array<i64: 1, 1, 256>}, {transform_indices = @transform_4, window_bounds = array<i64: 1, 1, 256>}]} {
    %c0_i32 = arith.constant 0 : i32
    %0 = arith.cmpi eq, %arg1, %c0_i32 : i32
    %1 = arith.extui %0 : i1 to i32
    %c0_i32_0 = arith.constant 0 : i32
    %2 = arith.cmpi ne, %1, %c0_i32_0 : i32
    scf.if %2 {
      %cst_23 = arith.constant 0.000000e+00 : f32
      %33 = vector.broadcast %cst_23 : f32 to vector<1x256xf32>
      %c0_24 = arith.constant 0 : index
      %c0_25 = arith.constant 0 : index
      %c0_26 = arith.constant 0 : index
      %34 = vector.load %arg5[%c0_24, %c0_25, %c0_26] : memref<1x1x256xf32, #tpu.memory_space<vmem>>, vector<1x1x256xf32>
      %35 = vector.shape_cast %34 : vector<1x1x256xf32> to vector<1x256xf32>
      %36 = vector.shape_cast %33 : vector<1x256xf32> to vector<1x1x256xf32>
      tpu.vector_store %arg5[%c0_24, %c0_25, %c0_26], %36 {strides = array<i32>} : memref<1x1x256xf32, #tpu.memory_space<vmem>>, vector<1x1x256xf32>,
      %cst_27 = arith.constant 0.000000e+00 : f32
      %37 = vector.broadcast %cst_27 : f32 to vector<1x256xf32>
      %c0_28 = arith.constant 0 : index
      %c0_29 = arith.constant 0 : index
      %c0_30 = arith.constant 0 : index
      %38 = vector.load %arg6[%c0_28, %c0_29, %c0_30] : memref<1x1x256xf32, #tpu.memory_space<vmem>>, vector<1x1x256xf32>
      %39 = vector.shape_cast %38 : vector<1x1x256xf32> to vector<1x256xf32>
      %40 = vector.shape_cast %37 : vector<1x256xf32> to vector<1x1x256xf32>
      tpu.vector_store %arg6[%c0_28, %c0_29, %c0_30], %40 {strides = array<i32>} : memref<1x1x256xf32, #tpu.memory_space<vmem>>, vector<1x1x256xf32>,
    } else {
    }
    %c0 = arith.constant 0 : index
    %c0_1 = arith.constant 0 : index
    %c0_2 = arith.constant 0 : index
    %3 = vector.load %arg2[%c0, %c0_1, %c0_2] : memref<1x3x256xf32, #tpu.memory_space<vmem>>, vector<1x3x256xf32>
    %4 = vector.shape_cast %3 : vector<1x3x256xf32> to vector<3x256xf32>
    %c0_3 = arith.constant 0 : index
    %c0_4 = arith.constant 0 : index
    %c0_5 = arith.constant 0 : index
    %5 = vector.load %arg3[%c0_3, %c0_4, %c0_5] : memref<1x3x256xf32, #tpu.memory_space<vmem>>, vector<1x3x256xf32>
    %6 = vector.shape_cast %5 : vector<1x3x256xf32> to vector<3x256xf32>
    %7 = arith.subf %4, %6 : vector<3x256xf32>
    %cst = arith.constant 9.99999997E-7 : f32
    %8 = vector.broadcast %cst : f32 to vector<3x256xf32>
    %9 = arith.addf %7, %8 : vector<3x256xf32>
    %10 = arith.mulf %9, %9 : vector<3x256xf32>
    %cst_6 = arith.constant dense<0.000000e+00> : vector<256xf32>
    %11 = vector.multi_reduction <add>, %10, %cst_6 [0] : vector<3x256xf32> to vector<256xf32>
    %12 = vector.shape_cast %11 : vector<256xf32> to vector<1x256xf32>
    %13 = math.sqrt %12 : vector<1x256xf32>
    %c0_7 = arith.constant 0 : index
    %c0_8 = arith.constant 0 : index
    %c0_9 = arith.constant 0 : index
    %14 = vector.load %arg4[%c0_7, %c0_8, %c0_9] : memref<1x1x256xf32, #tpu.memory_space<vmem>>, vector<1x1x256xf32>
    %15 = vector.shape_cast %14 : vector<1x1x256xf32> to vector<1x256xf32>
    %cst_10 = arith.constant 1.000000e+00 : f32
    %16 = vector.broadcast %cst_10 : f32 to vector<1x256xf32>
    %17 = arith.cmpf oeq, %15, %16 : vector<1x256xf32>
    %18 = arith.extui %17 : vector<1x256xi1> to vector<1x256xi32>
    %19 = arith.sitofp %18 : vector<1x256xi32> to vector<1x256xf32>
    %c0_11 = arith.constant 0 : index
    %c0_12 = arith.constant 0 : index
    %c0_13 = arith.constant 0 : index
    %20 = vector.load %arg5[%c0_11, %c0_12, %c0_13] : memref<1x1x256xf32, #tpu.memory_space<vmem>>, vector<1x1x256xf32>
    %21 = vector.shape_cast %20 : vector<1x1x256xf32> to vector<1x256xf32>
    %22 = arith.mulf %13, %19 : vector<1x256xf32>
    %23 = arith.addf %21, %22 : vector<1x256xf32>
    %c0_14 = arith.constant 0 : index
    %c0_15 = arith.constant 0 : index
    %c0_16 = arith.constant 0 : index
    %24 = vector.load %arg5[%c0_14, %c0_15, %c0_16] : memref<1x1x256xf32, #tpu.memory_space<vmem>>, vector<1x1x256xf32>
    %25 = vector.shape_cast %24 : vector<1x1x256xf32> to vector<1x256xf32>
    %26 = vector.shape_cast %23 : vector<1x256xf32> to vector<1x1x256xf32>
    tpu.vector_store %arg5[%c0_14, %c0_15, %c0_16], %26 {strides = array<i32>} : memref<1x1x256xf32, #tpu.memory_space<vmem>>, vector<1x1x256xf32>,
    %c0_17 = arith.constant 0 : index
    %c0_18 = arith.constant 0 : index
    %c0_19 = arith.constant 0 : index
    %27 = vector.load %arg6[%c0_17, %c0_18, %c0_19] : memref<1x1x256xf32, #tpu.memory_space<vmem>>, vector<1x1x256xf32>
    %28 = vector.shape_cast %27 : vector<1x1x256xf32> to vector<1x256xf32>
    %29 = arith.addf %28, %15 : vector<1x256xf32>
    %c0_20 = arith.constant 0 : index
    %c0_21 = arith.constant 0 : index
    %c0_22 = arith.constant 0 : index
    %30 = vector.load %arg6[%c0_20, %c0_21, %c0_22] : memref<1x1x256xf32, #tpu.memory_space<vmem>>, vector<1x1x256xf32>
    %31 = vector.shape_cast %30 : vector<1x1x256xf32> to vector<1x256xf32>
    %32 = vector.shape_cast %29 : vector<1x256xf32> to vector<1x1x256xf32>
    tpu.vector_store %arg6[%c0_20, %c0_21, %c0_22], %32 {strides = array<i32>} : memref<1x1x256xf32, #tpu.memory_space<vmem>>, vector<1x1x256xf32>,
    return
  }
  func.func @transform_0(%arg0: i32, %arg1: i32) -> (i32, i32, i32) {
    %c0_i32 = arith.constant 0 : i32
    %c0_i32_0 = arith.constant 0 : i32
    return %arg0, %c0_i32, %arg1 : i32, i32, i32
  }
  func.func @transform_1(%arg0: i32, %arg1: i32) -> (i32, i32, i32) {
    %c0_i32 = arith.constant 0 : i32
    %c0_i32_0 = arith.constant 0 : i32
    return %arg0, %c0_i32, %arg1 : i32, i32, i32
  }
  func.func @transform_2(%arg0: i32, %arg1: i32) -> (i32, i32, i32) {
    %c0_i32 = arith.constant 0 : i32
    %c0_i32_0 = arith.constant 0 : i32
    return %arg0, %c0_i32, %arg1 : i32, i32, i32
  }
  func.func @transform_3(%arg0: i32, %arg1: i32) -> (i32, i32, i32) {
    %c0_i32 = arith.constant 0 : i32
    %c0_i32_0 = arith.constant 0 : i32
    %c0_i32_1 = arith.constant 0 : i32
    return %arg0, %c0_i32, %c0_i32_0 : i32, i32, i32
  }
  func.func @transform_4(%arg0: i32, %arg1: i32) -> (i32, i32, i32) {
    %c0_i32 = arith.constant 0 : i32
    %c0_i32_0 = arith.constant 0 : i32
    %c0_i32_1 = arith.constant 0 : i32
    return %arg0, %c0_i32, %c0_i32_0 : i32, i32, i32
  }
}

</mosaic_0001>

<bundles_post_ra>
// kernel: tpu_custom_call.1
= control target key start
LH: loop header
LB: loop body
LE: loop exit
PB: predicated region body
PF: predicated region fallthrough
CT: control target
= control target key end

     0   :  { %10 = vsyncpa [#allocation3], 0  ;;  %s980_s0 = inlined_call_operand.vmem [shape: f32[2,3,256], index: 0, kind: input, shape index: {}]   ;;  %s981_s1 = inlined_call_operand.vmem [shape: f32[2,3,256], index: 1, kind: input, shape index: {}]   ;;  %s982_s2 = inlined_call_operand.vmem [shape: f32[2,1,256], index: 2, kind: input, shape index: {}]   ;;  %s983_s3 = inlined_call_operand.hbm [shape: f32[2,1,256], index: 3, kind: output, shape index: {0}]   ;;  %s984_s4 = inlined_call_operand.hbm [shape: f32[2,1,256], index: 4, kind: output, shape index: {1}]  }
   0x1   :  { %12 = vsyncpa [#allocation3 + $0x1], 0 }
   0x2   :  { %13 = vsyncpa [#allocation5], 0 }
   0x3   :  { %15 = vsyncpa [#allocation5 + $0x1], 0  ;;  %s800_s15 = smov 0   ;;  %s802_s16 = smov 0  }
   0x4   :  { %s804_s17 = smov 0   ;;  %s806_s18 = smov 0  }
   0x5   :  { %s808_s19 = smov 0   ;;  %s810_s20 = smov 0  }
   0x6 LB: > { %s568_s21 = sadd.s32 4294967295, %s769_s20   ;;  %s569_s22 = sadd.s32 4294967294, %s769_s20   ;;  %s769_s20 = sphi %s810_s20, %s21_s20   ;;  %s765_s19 = sphi %s808_s19, %s996_s19   ;;  %s761_s18 = sphi %s806_s18, %s995_s18   ;;  %s757_s17 = sphi %s804_s17, %s994_s17   ;;  %s753_s16 = sphi %s802_s16, %s993_s16   ;;  %s749_s15 = sphi %s800_s15, %s992_s15  }
   0x7   : > { %s33_s23 = sadd.s32 1, %s765_s19  ;;  %s124_s24 = sadd.s32 1, %s757_s17 }
   0x8   : > { %p35_p0 = scmp.ge.s32.totalorder %s33_s23, 2  ;;  %p134_p1 = scmp.ne.s32.totalorder %s757_s17, %s753_s16 }
   0x9   : > { %p135_p2 = scmp.eq.s32.totalorder %s568_s21, 1  ;;  %p140_p3 = scmp.ne.s32.totalorder %s753_s16, %s749_s15 }
   0xa   : > { %s998_s23 = smov (%p35_p0, %s33_s23), 0  ;;  %p141_p5 = scmp.eq.s32.totalorder %s569_s22, 1 }
   0xb   : > { %986 = sst [smem:[#allocation8_spill]] %s998_s23  ;;  %p840_p4 = por %p135_p2, %p134_p1 }
   0xc   : > { %s121_s26 = ssub.s32 %s765_s19, %s998_s23  ;;  %p572_p6 = scmp.ge.s32.totalorder %s769_s20, 1 }
   0xd   : > { %p122_p7 = scmp.eq.s32.totalorder %s121_s26, 0  ;;  %p847_p8 = por %p141_p5, %p140_p3 }
   0xe   : > { %p223_p9 = scmp.lt.s32.totalorder %s769_s20, 3 }
   0xf   : > { %s853_s28 = scalar_select %p122_p7, %s757_s17, %s124_s24  }
  0x10   : > { %p224_p10 = pnand %p572_p6, %p223_p9 }
  0x11   : > { %s856_s29 = sand.u32 (!%p224_p10), 1, %s753_s16   ;;  %p276_p11 = scmp.lt.s32.totalorder (!%p224_p10), %s761_s18, 1  ;;  %v308_v0 = vlaneseq (!%p224_p10)  ;;  %v771_v2 = vmov (!%p224_p10), 0.0   ;;  %vm322_vm1 = vcmask (!%p224_p10), 1042432  }
  0x12   : > { %227 = sbr.rel (%p224_p10) target bundleno = 103 (0x67), region = 32  ;;  %s573_s30 = sshll.u32 (!%p224_p10), %s856_s29, 1 }
  0x13   : > { %vm861_vm0 = vcmp.lt.s32.totalorder (!%p224_p10), %v308_v0, 256  ;;  %s866_s6 = scalar_lea.vmem (!%p224_p10), [#allocation2], %s573_s30  ;;  %s274_s7 = scalar_lea.vmem (!%p224_p10), [#allocation4], %s573_s30 }
  0x14   : > { %312 = vst.msk [vmem:[%s866_s6] sm:$0x3] (!%p224_p10), %vm861_vm0, %v771_v2  ;;  %313 = vst.msk [vmem:[%s274_s7] sm:$0x3] (!%p224_p10), %vm861_vm0, %v771_v2  ;;  %s591_s30 = sshll.u32 (!%p224_p10), %s761_s18, 5  ;;  %s430_s23 = sshll.u32 (!%p224_p10), %s274_s7, 4  ;;  %s892_s23 = int_to_ptr.vmem [resolvable:$true] %s430_s23 }
  0x15   : > { %s890_s10 = scalar_lea.hbm (!%p224_p10), %s984_s4, %s591_s30  ;;  %s659_s11 = scalar_lea.vmem (!%p224_p10), %s892_s23, 32 }
  0x16   : > { %p660_p12 = scmp.ne.s32.totalorder (!%p224_p10), %s892_s23, %s659_s11 }
  0x18   : > { %p661_p13 = pnand (!%p224_p10), %p660_p12, %p840_p4 }
  0x19   : > { %s277_s5 = scalar_select %p276_p11, %s761_s18, 1 }
  0x1a   : > { %p662_p0 = pneg %p661_p13 }
  0x1b   : > { %s589_s8 = sshll.u32 %s277_s5, 3  ;;  %s579_s9 = sshll.u32 %s277_s5, 1  ;;  %v393_v8 = vld [vmem:[%s274_s7] sm:$0x3] }
  0x1c   : > { %s283_s12 = scalar_lea.vmem %s980_s0, %s589_s8  ;;  %s293_s21 = scalar_lea.vmem %s981_s1, %s589_s8 }
  0x1d   : > { %v314_v3 = vld [vmem:[%s283_s12] sm:$0x77]  ;;  %s302_s26 = scalar_lea.vmem %s982_s2, %s579_s9  ;;  %s402_s9 = scalar_lea.sflag [#allocation5], %s856_s29 }
  0x1e   : > { %v315_v4 = vld [vmem:[%s293_s21] sm:$0x77]  ;;  %s772_s12 = smov [#allocation4]  }
  0x1f   : > { %v316_v5 = vsub.f32 %v314_v3, %v315_v4  ;;  %v351_v7 = vld [vmem:[%s302_s26] sm:$0x3]  ;;  %s663_s13 = sshll.u32 %s772_s12, 4  ;;  %s664_s13 = int_to_ptr.vmem [resolvable:$false] %s663_s13 }
  0x20   : > { %v394_v10 = vadd.f32 %v393_v8, %v351_v7  ;;  %s665_s14 = scalar_lea.vmem %s664_s13, 64  ;;  %p666_p1 = scmp.lt.s32.totalorder %s892_s23, %s664_s13 }
  0x21   : > { %v317_v6 = vadd.f32 1e-06, %v316_v5  ;;  %p667_p2 = scmp.lt.s32.totalorder %s665_s14, %s659_s11 }
  0x22   : > { %395 = vst.msk [vmem:[%s274_s7] sm:$0x3] %vm861_vm0, %v394_v10 }
  0x23   : > { %v318_v9 = vmul.f32 %v317_v6, %v317_v6  ;;  %p668_p3 = por %p667_p2, %p666_p1 }
  0x25   : > { %v320_v11 = vcombine.high %v318_v9, %v318_v9  ;;  %v323_v12 = vsel %vm322_vm1, %v318_v9, 0.0  ;;  %p669_p5 = pnand %p668_p3, %p662_p0 }
  0x26   : > { %v324_v13 = vrot.slane %v323_v12, 4 }
  0x27   : > { %672 = shalt.err (!%p669_p5)
}
  0x28   : > { %s673_s7 = scalar_lea.hbm %s890_s10, 32  ;;  %s677_s24 = scalar_lea.hbm %s984_s4, 64 }
  0x29   : > { %p674_p6 = scmp.ne.s32.totalorder %s890_s10, %s673_s7  ;;  %p678_p10 = scmp.lt.u32.totalorder %s890_s10, %s984_s4 }
  0x2a   : > { %p679_p11 = scmp.lt.u32.totalorder %s677_s24, %s673_s7  ;;  %p681_p13 = scmp.lt.u32.totalorder %s673_s7, %s890_s10 }
  0x2b   : > { %p675_p7 = pnand %p674_p6, %p840_p4 }
  0x2c   : > { %p680_p12 = por %p679_p11, %p678_p10 }
  0x2d   : > { %p676_p9 = pneg %p675_p7 }
  0x2e   : > { %p682_p0 = por %p681_p13, %p680_p12 }
  0x30   : > { %p683_p1 = pnand %p682_p0, %p676_p9 }
  0x32   : > { %686 = shalt.err (!%p683_p1)
}
  0x33   : > { %594 = dma.vmem_to_hbm [thread:$0]  (%p840_p4), %s892_s23, 32, %s890_s10, %s402_s9   ;;  %v330_v14 = vsel %vm322_vm1, %v320_v11, 0.0  ;;  %v325_v15 = vadd.f32 %v324_v13, %v323_v12  ;;  %v358_v26 = vshrl.u32 %v308_v0, 7  ;;  %vm352_vm2 = vcmp.eq.f32.partialorder %v351_v7, 1.0  ;;  %v355_v50 = vld [vmem:[%s866_s6] sm:$0x3] }
  0x34   : > { %v331_v16 = vrot.slane %v330_v14, 4  ;;  %v580_v28 = vsel %vm352_vm2, 1.0, %v771_v2  ;;  %v773_v29 = vmov 1966171168   ;;  %s416_s23 = sshll.u32 %s866_s6, 4  ;;  %s929_s9 = scalar_lea.hbm %s983_s3, %s591_s30  ;;  %s931_s23 = int_to_ptr.vmem [resolvable:$true] %s416_s23 }
  0x35   : > { %v326_v17 = vrot.slane %v325_v15, 2  ;;  %v359_v27 = vsub.s32 0, %v358_v26  ;;  %v373_v30 = vunpack.c.l.s4 %v773_v29  ;;  %v363_v31 = vsub.s32 1, %v358_v26  ;;  %s397_s11 = scalar_lea.sflag [#allocation3], %s856_s29  ;;  %s687_s12 = scalar_lea.vmem %s931_s23, 32 }
  0x36   : > { %v332_v18 = vadd.f32 %v331_v16, %v330_v14  ;;  %p688_p2 = scmp.ne.s32.totalorder %s931_s23, %s687_s12  ;;  %s774_s18 = smov [#allocation2]  }
  0x37   : > { %v327_v19 = vadd.f32 %v326_v17, %v325_v15  ;;  %v360_v35 = vrot.slane %v580_v28, %v359_v27  ;;  %v374_v38 = vunpack.c.0.s8 %v373_v30  ;;  %v364_v41 = vrot.slane %v580_v28, %v363_v31  ;;  %s691_s13 = sshll.u32 %s774_s18, 4  ;;  %s692_s13 = int_to_ptr.vmem [resolvable:$false] %s691_s13 }
  0x38   : > { %v333_v20 = vrot.slane %v332_v18, 2  ;;  %p689_p3 = pnand %p688_p2, %p840_p4  ;;  %s693_s14 = scalar_lea.vmem %s692_s13, 64 }
  0x39   : > { %v328_v21 = vrot.slane %v327_v19, 1  ;;  %v377_v47 = vsub.s32 %v374_v38, %v358_v26  ;;  %p694_p6 = scmp.lt.s32.totalorder %s931_s23, %s692_s13  ;;  %p695_p7 = scmp.lt.s32.totalorder %s693_s14, %s687_s12 }
  0x3a   : > { %v334_v22 = vadd.f32 %v333_v20, %v332_v18  ;;  %p690_p5 = pneg %p689_p3 }
  0x3b   : > { %v329_v23 = vadd.f32 %v328_v21, %v327_v19  ;;  %p696_p9 = por %p695_p7, %p694_p6 }
  0x3c   : > { %v335_v24 = vrot.slane %v334_v22, 1 }
  0x3d   : > { %655 = vrsqrt.f32 %v329_v23  ;;  %vm339_vm3 = vcmp.eq.f32.partialorder %v329_v23, inf  ;;  %v342_v33 = vand.u32 2147483648, %v329_v23  ;;  %vm341_vm4 = vcmp.eq.f32.partialorder %v329_v23, 0.0  ;;  %p697_p10 = pnand %p696_p9, %p690_p5 }
  0x3e   : > { %v336_v25 = vadd.f32 %v335_v24, %v334_v22 }
  0x40   : > { %657 = vrsqrt.f32 %v336_v25  ;;  %vm346_vm5 = vcmp.eq.f32.partialorder %v336_v25, inf  ;;  %v349_v37 = vand.u32 2147483648, %v336_v25  ;;  %vm348_vm6 = vcmp.eq.f32.partialorder %v336_v25, 0.0 }
  0x47   : > { %v656_v32 = vpop.eup %655 }
  0x48   : > { %v338_v34 = vmul.f32 %v656_v32, %v329_v23 }
  0x4a   : > { %v658_v36 = vpop.eup %657  ;;  %v340_v39 = vsel %vm339_vm3, %v329_v23, %v338_v34 }
  0x4b   : > { %v345_v40 = vmul.f32 %v658_v36, %v336_v25  ;;  %v343_v42 = vsel %vm341_vm4, %v342_v33, %v340_v39 }
  0x4c   : > { %v367_v44 = vmul.f32 %v360_v35, %v343_v42 }
  0x4d   : > { %v347_v43 = vsel %vm346_vm5, %v336_v25, %v345_v40 }
  0x4e   : > { %v350_v45 = vsel %vm348_vm6, %v349_v37, %v347_v43 }
  0x4f   : > { %v368_v46 = vmul.f32 %v364_v41, %v350_v45 }
  0x51   : > { %v371_v48 = vcombine.low %v367_v44, %v368_v46 }
  0x53   : > { %v378_v49 = vrot.slane %v371_v48, %v377_v47 }
  0x55   : > { %v385_v51 = vrot.slane %v378_v49, %v377_v47 }
  0x57   : > { %v387_v52 = vadd.f32 %v385_v51, %v355_v50 }
  0x59   : > { %392 = vst.msk [vmem:[%s866_s6] sm:$0x3] %vm861_vm0, %v387_v52 }
  0x5a   : > { %700 = shalt.err (!%p697_p10)
}
  0x5b   : > { %s701_s29 = scalar_lea.hbm %s929_s9, 32  ;;  %s705_s7 = scalar_lea.hbm %s983_s3, 64 }
  0x5c   : > { %p702_p11 = scmp.ne.s32.totalorder %s929_s9, %s701_s29  ;;  %p706_p0 = scmp.lt.u32.totalorder %s929_s9, %s983_s3 }
  0x5d   : > { %p707_p1 = scmp.lt.u32.totalorder %s705_s7, %s701_s29  ;;  %p709_p3 = scmp.lt.u32.totalorder %s701_s29, %s929_s9 }
  0x5e   : > { %p703_p12 = pnand %p702_p11, %p840_p4 }
  0x5f   : > { %p708_p2 = por %p707_p1, %p706_p0 }
  0x60   : > { %p704_p13 = pneg %p703_p12 }
  0x61   : > { %p710_p5 = por %p709_p3, %p708_p2 }
  0x63   : > { %p711_p6 = pnand %p710_p5, %p704_p13 }
  0x65   : > { %714 = shalt.err (!%p711_p6)
}
  0x66   : > { %593 = dma.vmem_to_hbm [thread:$0]  (%p840_p4), %s931_s23, 32, %s929_s9, %s397_s11  }
  0x67 PF: > { %p604_p7 = scmp.ge.s32.totalorder %s769_s20, 2  ;;  %s442_s24 = sand.u32 1, %s749_s15  }
  0x68   : > { %s443_s26 = scalar_lea.sflag [#allocation3], %s442_s24 }
  0x69   : > { %p598_p9 = pnand %p604_p7, %p847_p8 }
  0x6b   : > { %740 = dma.done.wait (!%p598_p9), %s443_s26, 32  }
  0x6c   : > { %742 = vsyncadd (!%p598_p9), %s443_s26, 4294967264  ;;  %s452_s5 = scalar_lea.sflag [#allocation5], %s442_s24 }
  0x6d   : > { %744 = dma.done.wait (!%p598_p9), %s452_s5, 32  }
  0x6e   : > { %746 = vsyncadd (!%p598_p9), %s452_s5, 4294967264  ;;  %s21_s20 = sadd.s32 1, %s769_s20   ;;  %s991_s25 = sld [smem:[#allocation8_spill]] }
  0x6f   : > { %p18_p10 = scmp.ge.s32.totalorder %s21_s20, 4   ;;  %s992_s15 = smov %s753_s16 }
  0x70   : > { %s993_s16 = smov %s757_s17  ;;  %s994_s17 = smov %s853_s28 }
  0x71   : > { %s995_s18 = smov %s765_s19  ;;  %20 = sbr.rel (!%p18_p10) target bundleno = 6 (0x6), region = 94 }
  0x74   : > { %s996_s19 = smov %s991_s25 }
  0x78   :  { %457 = vsyncpa [#allocation3], 1 }
  0x79   :  { %459 = vsyncpa [#allocation3 + $0x1], 1 }
  0x7a   :  { %460 = vsyncpa [#allocation5], 1 }
  0x7b   :  { %462 = vsyncpa [#allocation5 + $0x1], 1 }

</bundles_post_ra>
